<compile_context>
chip_gen: v7x
topology: tpu7x:2x2x1
jax: 0.10.0
libtpu: 0.0.40
codegen_flags: <defaults>
</compile_context>

<pallas_src>
import functools
import numpy as np

import jax
import jax.numpy as jnp
from jax.experimental import pallas as pl
from jax.experimental.pallas import tpu as pltpu


# ----------------------------------------------------------------------------------
# Small helpers
# ----------------------------------------------------------------------------------
def _round_up(x, m):
    return ((x + m - 1) // m) * m


def _pick_tile_m(m):
    target = _round_up(m, 16)
    for t in (256, 128, 64, 32, 16):
        if t <= target:
            return t
    return 16


_VMEM_LIMIT = 48 * 1024 * 1024          # stay well under v7x's 64 MiB physical VMEM
_DIRECT_X_BYTES = 12 * 1024 * 1024      # resident activation budget (incl. 2 buffers)
_DIRECT_W_BYTES = 8 * 1024 * 1024       # per-j weight block budget (incl. 2 buffers)


# ----------------------------------------------------------------------------------
# Pallas kernels
# ----------------------------------------------------------------------------------
def _mm_kernel(a_ref, b_ref, bias_ref, *rest, relu, moments):
    """Tiled matmul: (tm,tk)@(tk,tn) accumulated over the k grid axis, with fused
    bias (+ReLU) and optional per-row-block BN moments in the last-k epilogue."""
    if moments:
        mask_ref, o_ref, sum_ref, sq_ref, acc_ref = rest
    else:
        o_ref, acc_ref = rest

    @pl.when(pl.program_id(2) == 0)
    def _():
        acc_ref[...] = jnp.zeros_like(acc_ref)

    acc_ref[...] += jnp.dot(a_ref[...], b_ref[...],
                            preferred_element_type=jnp.float32)

    @pl.when(pl.program_id(2) == pl.num_programs(2) - 1)
    def _():
        r = acc_ref[...] + bias_ref[...]
        if relu:
            r = jnp.maximum(r, 0.0)
        o_ref[...] = r.astype(o_ref.dtype)
        if moments:
            rm = r * mask_ref[...]
            s = jnp.sum(rm, axis=0, keepdims=True)          # (1, tn)
            q = jnp.sum(rm * rm, axis=0, keepdims=True)
            sum_ref[...] = jnp.broadcast_to(s[:, None, :], sum_ref.shape)
            sq_ref[...] = jnp.broadcast_to(q[:, None, :], sq_ref.shape)


def _dconv_kernel(x_ref, w_ref, bias_ref, *rest, taps, tm, relu, moments):
    """Fused-im2col direct conv: the whole padded activation (flattened rows x Cin)
    is resident in VMEM; each kernel tap is a dynamic row-offset slice that feeds
    one MXU matmul.  Bias (+ReLU) and optional BN moments are fused."""
    if moments:
        mask_ref, o_ref, sum_ref, sq_ref, acc_ref = rest
    else:
        o_ref, acc_ref = rest

    row0 = pl.multiple_of(pl.program_id(0) * tm, tm)
    acc_ref[...] = jnp.zeros_like(acc_ref)
    for t, off in enumerate(taps):                       # static unroll, <= 9 taps
        a = x_ref[pl.ds(row0 + off, tm), :]              # (tm, Cin) bf16
        acc_ref[...] += jnp.dot(a, w_ref[t],
                                preferred_element_type=jnp.float32)

    r = acc_ref[...] + bias_ref[...]
    if relu:
        r = jnp.maximum(r, 0.0)
    o_ref[...] = r.astype(o_ref.dtype)
    if moments:
        rm = r * mask_ref[...]
        s = jnp.sum(rm, axis=0, keepdims=True)
        q = jnp.sum(rm * rm, axis=0, keepdims=True)
        sum_ref[...] = jnp.broadcast_to(s[:, None, :], sum_ref.shape)
        sq_ref[...] = jnp.broadcast_to(q[:, None, :], sq_ref.shape)


def _affine_kernel(x_ref, *rest, relu, has_res):
    """y = x*scale + shift (+ residual) (+ ReLU), tiled over rows, bf16 in/out."""
    if has_res:
        r_ref, s_ref, t_ref, o_ref = rest
    else:
        s_ref, t_ref, o_ref = rest
    y = x_ref[...].astype(jnp.float32) * s_ref[...] + t_ref[...]
    if has_res:
        y = y + r_ref[...].astype(jnp.float32)
    if relu:
        y = jnp.maximum(y, 0.0)
    o_ref[...] = y.astype(o_ref.dtype)


def _pool_kernel(x_ref, s_ref, t_ref, o_ref, *, affine):
    """2x2 max-pool over (row-pair, lane-pair) layout, optionally fused with a
    preceding BN affine + ReLU (the stem's bn1/relu)."""
    x = x_ref[...].astype(jnp.float32)                   # (bm, 2, W/2, 2C)
    if affine:
        x = jnp.maximum(x * s_ref[...] + t_ref[...], 0.0)
    hm = jnp.maximum(x[:, 0], x[:, 1])                   # (bm, W/2, 2C)
    c = o_ref.shape[-1]
    o_ref[...] = jnp.maximum(hm[..., :c], hm[..., c:]).astype(o_ref.dtype)


# ----------------------------------------------------------------------------------
# Conv wrappers (bf16 MXU, fused bias/ReLU/moments)
# ----------------------------------------------------------------------------------
def _matmul_fused(a, b, bias, *, relu, moments, out_dtype, m_valid):
    M, K = a.shape
    _, N = b.shape
    tm = _pick_tile_m(M)
    tn = 256 if _round_up(N, 128) >= 256 else 128
    Mp = _round_up(M, tm)
    Np = _round_up(N, tn)
    kp0 = _round_up(K, 128)
    if kp0 <= 1024:
        Kp = _round_up(K, 16)
        tk = Kp
    else:
        tk = next(c for c in (512, 384, 256, 128) if kp0 % c == 0)
        Kp = kp0

    a = a.astype(jnp.bfloat16)
    b = b.astype(jnp.bfloat16)
    if (Mp, Kp) != (M, K):
        a = jnp.pad(a, ((0, Mp - M), (0, Kp - K)))
    if (Kp, Np) != (K, N):
        b = jnp.pad(b, ((0, Kp - K), (0, Np - N)))
    biasp = bias.astype(jnp.float32)
    if Np != N:
        biasp = jnp.pad(biasp, (0, Np - N))
    biasp = biasp.reshape(1, Np)

    grid = (Mp // tm, Np // tn, Kp // tk)
    in_specs = [
        pl.BlockSpec((tm, tk), lambda i, j, k: (i, k)),
        pl.BlockSpec((tk, tn), lambda i, j, k: (k, j)),
        pl.BlockSpec((1, tn), lambda i, j, k: (0, j)),
    ]
    inputs = [a, b, biasp]
    out_shapes = [jax.ShapeDtypeStruct((Mp, Np), out_dtype)]
    out_specs = [pl.BlockSpec((tm, tn), lambda i, j, k: (i, j))]
    if moments:
        mask = (jnp.arange(Mp) < m_valid).astype(jnp.float32).reshape(Mp, 1)
        inputs.append(mask)
        in_specs.append(pl.BlockSpec((tm, 1), lambda i, j, k: (i, 0)))
        nblk = Mp // tm
        out_shapes += [jax.ShapeDtypeStruct((nblk, 8, Np), jnp.float32)] * 2
        out_specs += [pl.BlockSpec((1, 8, tn), lambda i, j, k: (i, 0, j))] * 2

    outs = pl.pallas_call(
        functools.partial(_mm_kernel, relu=relu, moments=moments),
        grid=grid,
        in_specs=in_specs,
        out_shape=tuple(out_shapes),
        out_specs=tuple(out_specs),
        scratch_shapes=[pltpu.VMEM((tm, tn), jnp.float32)],
        compiler_params=pltpu.CompilerParams(
            dimension_semantics=("parallel", "parallel", "arbitrary"),
            vmem_limit_bytes=_VMEM_LIMIT),
    )(*inputs)

    out = outs[0][:M, :N]
    if moments:
        sums = outs[1][:, 0, :].sum(axis=0)[:N]
        sq = outs[2][:, 0, :].sum(axis=0)[:N]
        return out, sums, sq
    return out


def _conv_direct(x, w, bias, *, padding, relu, moments, out_dtype):
    """Stride-1 KxK conv with im2col fused into the kernel (no patches in HBM)."""
    N, H, W, Cin = x.shape
    KH, KW, _, Cout = w.shape
    Hp, Wp = H + 2 * padding, W + 2 * padding
    OH, OW = Hp - KH + 1, Wp - KW + 1
    xp = jnp.pad(x, ((0, 0), (padding, padding), (padding, padding), (0, 0)))
    Mdom = N * Hp * Wp
    tm = _pick_tile_m(Mdom)
    Mp = _round_up(Mdom, tm)
    maxoff = (KH - 1) * Wp + (KW - 1)
    Mx = Mp + maxoff
    xf = jnp.pad(xp.reshape(Mdom, Cin), ((0, Mx - Mdom), (0, 0)))

    T = KH * KW
    tn = 256 if _round_up(Cout, 128) >= 256 else 128
    Np = _round_up(Cout, tn)
    wt = w.reshape(T, Cin, Cout)
    if Np != Cout:
        wt = jnp.pad(wt, ((0, 0), (0, 0), (0, Np - Cout)))
    biasp = bias.astype(jnp.float32)
    if Np != Cout:
        biasp = jnp.pad(biasp, (0, Np - Cout))
    biasp = biasp.reshape(1, Np)

    taps = tuple(kh * Wp + kw for kh in range(KH) for kw in range(KW))
    grid = (Mp // tm, Np // tn)

    in_specs = [
        pl.BlockSpec((Mx, Cin), lambda i, j: (0, 0)),       # resident activation
        pl.BlockSpec((T, Cin, tn), lambda i, j: (0, 0, j)),
        pl.BlockSpec((1, tn), lambda i, j: (0, j)),
    ]
    inputs = [xf, wt, biasp]
    out_shapes = [jax.ShapeDtypeStruct((Mp, Np), out_dtype)]
    out_specs = [pl.BlockSpec((tm, tn), lambda i, j: (i, j))]
    if moments:
        idx = jnp.arange(Mp)
        qq = idx % (Hp * Wp)
        valid = (idx < Mdom) & ((qq // Wp) < OH) & ((qq % Wp) < OW)
        mask = valid.astype(jnp.float32).reshape(Mp, 1)
        inputs.append(mask)
        in_specs.append(pl.BlockSpec((tm, 1), lambda i, j: (i, 0)))
        nblk = Mp // tm
        out_shapes += [jax.ShapeDtypeStruct((nblk, 8, Np), jnp.float32)] * 2
        out_specs += [pl.BlockSpec((1, 8, tn), lambda i, j: (i, 0, j))] * 2

    outs = pl.pallas_call(
        functools.partial(_dconv_kernel, taps=taps, tm=tm, relu=relu,
                          moments=moments),
        grid=grid,
        in_specs=in_specs,
        out_shape=tuple(out_shapes),
        out_specs=tuple(out_specs),
        scratch_shapes=[pltpu.VMEM((tm, tn), jnp.float32)],
        compiler_params=pltpu.CompilerParams(
            dimension_semantics=("parallel", "parallel"),
            vmem_limit_bytes=_VMEM_LIMIT),
    )(*inputs)

    y = outs[0][:Mdom, :Cout].reshape(N, Hp, Wp, Cout)[:, :OH, :OW, :]
    if moments:
        sums = outs[1][:, 0, :].sum(axis=0)[:Cout]
        sq = outs[2][:, 0, :].sum(axis=0)[:Cout]
        return y, sums, sq
    return y


def _im2col_conv(x, w, bias, *, stride, padding, relu, moments, out_dtype):
    N, H, W, Cin = x.shape
    KH, KW, _, Cout = w.shape
    OH = (H + 2 * padding - KH) // stride + 1
    OW = (W + 2 * padding - KW) // stride + 1
    xp = x
    if padding:
        xp = jnp.pad(x, ((0, 0), (padding, padding), (padding, padding), (0, 0)))
    cols = []
    for kh in range(KH):
        for kw in range(KW):
            cols.append(xp[:, kh:kh + stride * OH:stride, kw:kw + stride * OW:stride, :])
    if len(cols) == 1:
        patches = cols[0].reshape(N * OH * OW, Cin)
    else:
        patches = jnp.stack(cols, axis=3).reshape(N * OH * OW, KH * KW * Cin)
    res = _matmul_fused(patches, w.reshape(KH * KW * Cin, Cout), bias,
                        relu=relu, moments=moments, out_dtype=out_dtype,
                        m_valid=N * OH * OW)
    if moments:
        out, s, q = res
        return out.reshape(N, OH, OW, Cout), s, q
    return res.reshape(N, OH, OW, Cout)


@functools.partial(jax.jit,
                   static_argnames=("stride", "padding", "relu", "moments", "out_dtype"))
def conv2d(x, w, bias, *, stride=1, padding=0, relu=False, moments=False,
           out_dtype=jnp.bfloat16):
    """x: (N,H,W,Cin) bf16, w: (KH,KW,Cin,Cout) bf16, bias: (Cout,) f32."""
    x = x.astype(jnp.bfloat16)
    w = w.astype(jnp.bfloat16)
    N, H, W, Cin = x.shape
    KH, KW, _, Cout = w.shape

    if KH == 1 and KW == 1 and stride == 1 and padding == 0:
        a = x.reshape(N * H * W, Cin)
        res = _matmul_fused(a, w.reshape(Cin, Cout), bias, relu=relu,
                            moments=moments, out_dtype=out_dtype,
                            m_valid=N * H * W)
        if moments:
            out, s, q = res
            return out.reshape(N, H, W, Cout), s, q
        return res.reshape(N, H, W, Cout)

    if stride == 1 and KH * KW > 1:
        Hp, Wp = H + 2 * padding, W + 2 * padding
        Mdom = N * Hp * Wp
        tm = _pick_tile_m(Mdom)
        Mx = _round_up(Mdom, tm) + (KH - 1) * Wp + (KW - 1)
        tn = 256 if _round_up(Cout, 128) >= 256 else 128
        x_bytes = Mx * _round_up(Cin, 128) * 2 * 2
        w_bytes = KH * KW * Cin * tn * 2 * 2
        if x_bytes <= _DIRECT_X_BYTES and w_bytes <= _DIRECT_W_BYTES:
            return _conv_direct(x, w, bias, padding=padding, relu=relu,
                                moments=moments, out_dtype=out_dtype)

    return _im2col_conv(x, w, bias, stride=stride, padding=padding,
                        relu=relu, moments=moments, out_dtype=out_dtype)


# ----------------------------------------------------------------------------------
# ConvTranspose2d(4,2,1) == stride-1 3x3 "phase" conv + pixel shuffle (exact)
# ----------------------------------------------------------------------------------
_KIDX = ((3, 1), (2, 0))


def _deconv_to_phase_conv(w_t):
    """PyTorch ConvTranspose2d(k=4,s=2,p=1) weight (Cin,Cout,4,4) -> equivalent
    stride-1 3x3 conv weight (3,3,Cin,4*Cout); output channel group (a,b) is the
    (2m+a, 2j+b) sub-pixel phase."""
    cin, cout = w_t.shape[0], w_t.shape[1]
    wc = jnp.zeros((3, 3, cin, 2, 2, cout), w_t.dtype)
    for a in range(2):
        for b in range(2):
            for dh in range(2):
                for dw in range(2):
                    wc = wc.at[a + dh, b + dw, :, a, b, :].set(
                        w_t[:, :, _KIDX[a][dh], _KIDX[b][dw]])
    return wc.reshape(3, 3, cin, 4 * cout)


@jax.jit
def _pixel_shuffle2(y4):
    N, H, W, C4 = y4.shape
    C = C4 // 4
    return (y4.reshape(N, H, W, 2, 2, C)
              .transpose(0, 1, 3, 2, 4, 5)
              .reshape(N, 2 * H, 2 * W, C))


def conv_transpose2d(x, w_phase, bias4, *, relu=True):
    y4 = conv2d(x, w_phase, bias4, stride=1, padding=1, relu=relu)
    return _pixel_shuffle2(y4)


# ----------------------------------------------------------------------------------
# BatchNorm (training-mode batch stats, moments come fused from the conv kernels)
# ----------------------------------------------------------------------------------
def _bn_coeffs(sums, sumsq, gamma, beta, count, eps=1e-5):
    mean = sums / count
    var = jnp.maximum(sumsq / count - mean * mean, 0.0)
    scale = gamma / jnp.sqrt(var + eps)
    shift = beta - mean * scale
    return scale, shift


def _affine_op(x2, scale, shift, *, relu, residual=None):
    M, C = x2.shape
    f = 1
    if C < 128 and 128 % C == 0 and M % (128 // C) == 0:
        f = 128 // C                                  # lane-dense folding for C<128
    Mf, Cf = M // f, C * f
    xr = x2.reshape(Mf, Cf)
    s = jnp.tile(scale.astype(jnp.float32), f).reshape(1, Cf)
    t = jnp.tile(shift.astype(jnp.float32), f).reshape(1, Cf)
    bm = Mf if Mf <= 512 else 512
    grid = (pl.cdiv(Mf, bm),)

    in_specs = [pl.BlockSpec((bm, Cf), lambda i: (i, 0)),
                pl.BlockSpec((1, Cf), lambda i: (0, 0)),
                pl.BlockSpec((1, Cf), lambda i: (0, 0))]
    inputs = [xr, s, t]
    if residual is not None:
        in_specs.insert(1, pl.BlockSpec((bm, Cf), lambda i: (i, 0)))
        inputs.insert(1, residual.reshape(Mf, Cf))

    out = pl.pallas_call(
        functools.partial(_affine_kernel, relu=relu, has_res=residual is not None),
        grid=grid,
        in_specs=in_specs,
        out_shape=jax.ShapeDtypeStruct((Mf, Cf), jnp.bfloat16),
        out_specs=pl.BlockSpec((bm, Cf), lambda i: (i, 0)),
        compiler_params=pltpu.CompilerParams(
            dimension_semantics=("parallel",), vmem_limit_bytes=_VMEM_LIMIT),
    )(*inputs)
    return out.reshape(M, C)


@functools.partial(jax.jit, static_argnames=("relu",))
def bn_affine(y, sums, sumsq, gamma, beta, *, relu, residual=None, eps=1e-5):
    N, H, W, C = y.shape
    scale, shift = _bn_coeffs(sums, sumsq, gamma, beta, N * H * W, eps)
    res2 = None if residual is None else residual.reshape(-1, C)
    out = _affine_op(y.reshape(-1, C), scale, shift, relu=relu, residual=res2)
    return out.reshape(N, H, W, C)


# ----------------------------------------------------------------------------------
# MaxPool2d(2,2), optionally fused with preceding BN affine + ReLU
# ----------------------------------------------------------------------------------
@functools.partial(jax.jit, static_argnames=("affine",))
def maxpool2x2(x, scale=None, shift=None, *, affine=False):
    N, H, W, C = x.shape
    R, Wh, C2 = N * (H // 2), W // 2, 2 * C
    xr = x.reshape(R, 2, Wh, C2)                      # free reshape: W-pairs on lanes
    if affine:
        s = jnp.tile(scale.astype(jnp.float32), 2).reshape(1, C2)
        t = jnp.tile(shift.astype(jnp.float32), 2).reshape(1, C2)
    else:
        s = jnp.ones((1, C2), jnp.float32)
        t = jnp.zeros((1, C2), jnp.float32)
    bm = R if R <= 256 else 256
    grid = (pl.cdiv(R, bm),)
    out = pl.pallas_call(
        functools.partial(_pool_kernel, affine=affine),
        grid=grid,
        in_specs=[pl.BlockSpec((bm, 2, Wh, C2), lambda i: (i, 0, 0, 0)),
                  pl.BlockSpec((1, C2), lambda i: (0, 0)),
                  pl.BlockSpec((1, C2), lambda i: (0, 0))],
        out_shape=jax.ShapeDtypeStruct((R, Wh, C), jnp.bfloat16),
        out_specs=pl.BlockSpec((bm, Wh, C), lambda i: (i, 0, 0)),
        compiler_params=pltpu.CompilerParams(
            dimension_semantics=("parallel",), vmem_limit_bytes=_VMEM_LIMIT),
    )(xr, s, t)
    return out.reshape(N, H // 2, W // 2, C)


def _zero_bias(w):
    return jnp.zeros((w.shape[-1],), jnp.float32)


# ----------------------------------------------------------------------------------
# Parameter construction (deterministic, synthetic)
# ----------------------------------------------------------------------------------
class Init:
    def __init__(self, seed=0):
        self.key = jax.random.PRNGKey(seed)
        self.count = 0

    def _next(self):
        self.count += 1
        return jax.random.fold_in(self.key, self.count)

    def conv(self, kh, kw, cin, cout, bias=False):
        fan_in = kh * kw * cin
        w = (jax.random.normal(self._next(), (kh, kw, cin, cout), jnp.float32)
             / np.sqrt(fan_in)).astype(jnp.bfloat16)
        b = (jax.random.normal(self._next(), (cout,), jnp.float32) * 0.01
             if bias else jnp.zeros((cout,), jnp.float32))
        return w, b

    def conv_t(self, cin, cout, kh, kw):
        fan = kh * kw * cout
        w = jax.random.normal(self._next(), (cin, cout, kh, kw), jnp.float32) / np.sqrt(fan)
        b = jax.random.normal(self._next(), (cout,), jnp.float32) * 0.01
        wc = _deconv_to_phase_conv(w).astype(jnp.bfloat16)
        return wc, jnp.tile(b, 4)

    def bn(self, c):
        return jnp.ones((c,), jnp.float32), jnp.zeros((c,), jnp.float32)


def make_layer(init, inplanes, planes, blocks, stride):
    layer = []
    for i in range(blocks):
        s = stride if i == 0 else 1
        p = {"stride": s}
        p["w1"], _ = init.conv(1, 1, inplanes, planes)
        p["bn1"] = init.bn(planes)
        p["w2"], _ = init.conv(3, 3, planes, planes)
        p["bn2"] = init.bn(planes)
        p["w3"], _ = init.conv(1, 1, planes, planes * 4)
        p["bn3"] = init.bn(planes * 4)
        if i == 0 and (stride != 1 or inplanes != planes * 4):
            p["wd"], _ = init.conv(1, 1, inplanes, planes * 4)
            p["bnd"] = init.bn(planes * 4)
        layer.append(p)
        inplanes = planes * 4
    return layer, inplanes


def make_decoder_block(init, cin, cmid, cout):
    p = {}
    p["w1"], p["b1"] = init.conv(3, 3, cin, cmid, bias=True)
    p["wt"], p["bt"] = init.conv_t(cmid, cout, 4, 4)
    return p


def build_params(n_class, seed=0):
    init = Init(seed)
    P = {}
    P["conv1_w"], _ = init.conv(7, 7, 3, 64)          # resnet101 conv1, bias=False
    P["bn1"] = init.bn(64)
    inpl = 64
    P["layer1"], inpl = make_layer(init, inpl, 64, 3, 1)     # -> 256
    P["layer2"], inpl = make_layer(init, inpl, 128, 4, 2)    # -> 512
    P["layer3"], inpl = make_layer(init, inpl, 256, 23, 2)   # -> 1024
    P["layer4"], inpl = make_layer(init, inpl, 512, 3, 2)    # -> 2048
    P["center"] = make_decoder_block(init, 2048, 512, 256)
    P["dec5"] = make_decoder_block(init, 2048 + 256, 512, 256)
    P["dec4"] = make_decoder_block(init, 1024 + 256, 512, 256)
    P["dec3"] = make_decoder_block(init, 512 + 256, 256, 64)
    P["dec2"] = make_decoder_block(init, 256 + 64, 128, 128)
    P["dec1"] = make_decoder_block(init, 128, 128, 32)
    P["dec0_w"], P["dec0_b"] = init.conv(3, 3, 32, 32, bias=True)
    P["final_w"], P["final_b"] = init.conv(1, 1, 32, n_class, bias=True)
    return P


# ----------------------------------------------------------------------------------
# Forward pass (matches UNetResNet.forward semantics)
# ----------------------------------------------------------------------------------
def bottleneck_forward(x, p):
    s = p["stride"]
    out, ms, mq = conv2d(x, p["w1"], _zero_bias(p["w1"]), stride=1, padding=0, moments=True)
    out = bn_affine(out, ms, mq, *p["bn1"], relu=True)
    out, ms, mq = conv2d(out, p["w2"], _zero_bias(p["w2"]), stride=s, padding=1, moments=True)
    out = bn_affine(out, ms, mq, *p["bn2"], relu=True)
    out, ms, mq = conv2d(out, p["w3"], _zero_bias(p["w3"]), stride=1, padding=0, moments=True)
    if "wd" in p:
        idt, ds_, dq = conv2d(x, p["wd"], _zero_bias(p["wd"]), stride=s, padding=0, moments=True)
        idt = bn_affine(idt, ds_, dq, *p["bnd"], relu=False)
    else:
        idt = x
    return bn_affine(out, ms, mq, *p["bn3"], relu=True, residual=idt)   # bn3 + add + relu


def run_layer(x, layer_params):
    for p in layer_params:
        x = bottleneck_forward(x, p)
    return x


def decoder_forward(x, p):
    x = conv2d(x, p["w1"], p["b1"], stride=1, padding=1, relu=True)      # ConvRelu
    x = conv_transpose2d(x, p["wt"], p["bt"], relu=True)                 # ConvT + ReLU
    return x


def unet_resnet_forward(x_nchw, P):
    x = jnp.transpose(x_nchw, (0, 2, 3, 1)).astype(jnp.bfloat16)         # NCHW -> NHWC

    # conv1 = Sequential(conv7x7 s2, bn1, relu, MaxPool2d(2,2)); bn+relu+pool fused.
    c, ms, mq = conv2d(x, P["conv1_w"], jnp.zeros((64,), jnp.float32),
                       stride=2, padding=3, moments=True)
    n, h, w, _ = c.shape
    scale, shift = _bn_coeffs(ms, mq, *P["bn1"], count=n * h * w)
    conv1 = maxpool2x2(c, scale, shift, affine=True)

    conv2 = run_layer(conv1, P["layer1"])
    conv3 = run_layer(conv2, P["layer2"])
    conv4 = run_layer(conv3, P["layer3"])
    conv5 = run_layer(conv4, P["layer4"])

    pool = maxpool2x2(conv5)

    center = decoder_forward(pool, P["center"])
    dec5 = decoder_forward(jnp.concatenate([center, conv5], axis=-1), P["dec5"])
    dec4 = decoder_forward(jnp.concatenate([dec5, conv4], axis=-1), P["dec4"])
    dec3 = decoder_forward(jnp.concatenate([dec4, conv3], axis=-1), P["dec3"])
    dec2 = decoder_forward(jnp.concatenate([dec3, conv2], axis=-1), P["dec2"])
    dec1 = decoder_forward(dec2, P["dec1"])
    dec0 = conv2d(dec1, P["dec0_w"], P["dec0_b"], stride=1, padding=1, relu=True)
    out = conv2d(dec0, P["final_w"], P["final_b"], stride=1, padding=0,
                 out_dtype=jnp.float32)
    return jnp.transpose(out, (0, 3, 1, 2))                              # NHWC -> NCHW


if __name__ == "__main__":
    n_class = 3
    # Smallest spatial size consistent with the architecture (needs 64x divisibility):
    x = jax.random.normal(jax.random.PRNGKey(0), (2, 3, 64, 64), jnp.float32)
    params = build_params(n_class=n_class, seed=0)
    out = unet_resnet_forward(x, params)
    out = jax.block_until_ready(out)
    assert out.shape == (2, n_class, 64, 64), out.shape
    assert bool(jnp.all(jnp.isfinite(out)))
    print("KERNEL_OK")
</pallas_src>

<mosaic_0001>
module attributes {stable_mosaic.version = 11 : i64} {
  func.func @_mm_kernel(%arg0: i32, %arg1: i32, %arg2: i32, %arg3: memref<256x160xbf16, #tpu.memory_space<vmem>>, %arg4: memref<160x128xbf16, #tpu.memory_space<vmem>>, %arg5: memref<1x128xf32, #tpu.memory_space<vmem>>, %arg6: memref<256x1xf32, #tpu.memory_space<vmem>>, %arg7: memref<256x128xbf16, #tpu.memory_space<vmem>>, %arg8: memref<1x8x128xf32, #tpu.memory_space<vmem>>, %arg9: memref<1x8x128xf32, #tpu.memory_space<vmem>>, %arg10: memref<256x128xf32, #tpu.memory_space<vmem>>) attributes {dimension_semantics = [#tpu.dimension_semantics<parallel>, #tpu.dimension_semantics<parallel>, #tpu.dimension_semantics<arbitrary>], iteration_bounds = array<i64: 8, 1, 1>, scalar_prefetch = 0 : i64, scratch_operands = 1 : i64, tpu.core_type = #tpu.core_type<tc>, window_params = [{transform_indices = @transform_0, window_bounds = array<i64: 256, 160>}, {transform_indices = @transform_1, window_bounds = array<i64: 160, 128>}, {transform_indices = @transform_2, window_bounds = array<i64: 1, 128>}, {transform_indices = @transform_3, window_bounds = array<i64: 256, 1>}, {transform_indices = @transform_4, window_bounds = array<i64: 256, 128>}, {transform_indices = @transform_5, window_bounds = array<i64: 1, 8, 128>}, {transform_indices = @transform_6, window_bounds = array<i64: 1, 8, 128>}]} {
    %c0_i32 = arith.constant 0 : i32
    %0 = arith.cmpi eq, %arg2, %c0_i32 : i32
    %1 = arith.extui %0 : i1 to i32
    %c0_i32_0 = arith.constant 0 : i32
    %2 = arith.cmpi ne, %1, %c0_i32_0 : i32
    scf.if %2 {
      %cst_10 = arith.constant 0.000000e+00 : f32
      %12 = vector.broadcast %cst_10 : f32 to vector<256x128xf32>
      %c0_11 = arith.constant 0 : index
      %c0_12 = arith.constant 0 : index
      %13 = vector.load %arg10[%c0_11, %c0_12] : memref<256x128xf32, #tpu.memory_space<vmem>>, vector<256x128xf32>
      tpu.vector_store %arg10[%c0_11, %c0_12], %12 {strides = array<i32>} : memref<256x128xf32, #tpu.memory_space<vmem>>, vector<256x128xf32>,
    } else {
    }
    %c0 = arith.constant 0 : index
    %c0_1 = arith.constant 0 : index
    %3 = vector.load %arg10[%c0, %c0_1] : memref<256x128xf32, #tpu.memory_space<vmem>>, vector<256x128xf32>
    %c0_2 = arith.constant 0 : index
    %c0_3 = arith.constant 0 : index
    %4 = vector.load %arg3[%c0_2, %c0_3] : memref<256x160xbf16, #tpu.memory_space<vmem>>, vector<256x160xbf16>
    %c0_4 = arith.constant 0 : index
    %c0_5 = arith.constant 0 : index
    %5 = vector.load %arg4[%c0_4, %c0_5] : memref<160x128xbf16, #tpu.memory_space<vmem>>, vector<160x128xbf16>
    %cst = arith.constant dense<0.000000e+00> : vector<256x128xf32>
    %6 = tpu.matmul %4, %5, %cst {dimension_numbers = #tpu.dot_dimension_numbers<[1], [0], [0], [1], [0, 0, 1, 1], [], []>} : vector<256x160xbf16>, vector<160x128xbf16>, vector<256x128xf32> -> vector<256x128xf32>
    %7 = arith.addf %3, %6 : vector<256x128xf32>
    %c0_6 = arith.constant 0 : index
    %c0_7 = arith.constant 0 : index
    %8 = vector.load %arg10[%c0_6, %c0_7] : memref<256x128xf32, #tpu.memory_space<vmem>>, vector<256x128xf32>
    tpu.vector_store %arg10[%c0_6, %c0_7], %7 {strides = array<i32>} : memref<256x128xf32, #tpu.memory_space<vmem>>, vector<256x128xf32>,
    %c0_i32_8 = arith.constant 0 : i32
    %9 = arith.cmpi eq, %arg2, %c0_i32_8 : i32
    %10 = arith.extui %9 : i1 to i32
    %c0_i32_9 = arith.constant 0 : i32
    %11 = arith.cmpi ne, %10, %c0_i32_9 : i32
    scf.if %11 {
      %c0_10 = arith.constant 0 : index
      %c0_11 = arith.constant 0 : index
      %12 = vector.load %arg10[%c0_10, %c0_11] : memref<256x128xf32, #tpu.memory_space<vmem>>, vector<256x128xf32>
      %c0_12 = arith.constant 0 : index
      %c0_13 = arith.constant 0 : index
      %13 = vector.load %arg5[%c0_12, %c0_13] : memref<1x128xf32, #tpu.memory_space<vmem>>, vector<1x128xf32>
      %14 = vector.broadcast %13 : vector<1x128xf32> to vector<256x128xf32>
      %15 = arith.addf %12, %14 : vector<256x128xf32>
      %16 = arith.truncf %15 : vector<256x128xf32> to vector<256x128xbf16>
      %c0_14 = arith.constant 0 : index
      %c0_15 = arith.constant 0 : index
      %17 = vector.load %arg7[%c0_14, %c0_15] : memref<256x128xbf16, #tpu.memory_space<vmem>>, vector<256x128xbf16>
      tpu.vector_store %arg7[%c0_14, %c0_15], %16 {strides = array<i32>} : memref<256x128xbf16, #tpu.memory_space<vmem>>, vector<256x128xbf16>,
      %c0_16 = arith.constant 0 : index
      %c0_17 = arith.constant 0 : index
      %18 = vector.load %arg6[%c0_16, %c0_17] : memref<256x1xf32, #tpu.memory_space<vmem>>, vector<256x1xf32>
      %19 = vector.broadcast %18 : vector<256x1xf32> to vector<256x128xf32>
      %20 = arith.mulf %15, %19 : vector<256x128xf32>
      %cst_18 = arith.constant dense<0.000000e+00> : vector<128xf32>
      %21 = vector.multi_reduction <add>, %20, %cst_18 [0] : vector<256x128xf32> to vector<128xf32>
      %22 = vector.shape_cast %21 : vector<128xf32> to vector<1x128xf32>
      %23 = arith.mulf %20, %20 : vector<256x128xf32>
      %cst_19 = arith.constant dense<0.000000e+00> : vector<128xf32>
      %24 = vector.multi_reduction <add>, %23, %cst_19 [0] : vector<256x128xf32> to vector<128xf32>
      %25 = vector.shape_cast %24 : vector<128xf32> to vector<1x128xf32>
      %26 = vector.shape_cast %22 : vector<1x128xf32> to vector<1x1x128xf32>
      %27 = vector.shape_cast %26 : vector<1x1x128xf32> to vector<1x1x128xf32>
      %28 = vector.broadcast %27 : vector<1x1x128xf32> to vector<1x8x128xf32>
      %c0_20 = arith.constant 0 : index
      %c0_21 = arith.constant 0 : index
      %c0_22 = arith.constant 0 : index
      %29 = vector.load %arg8[%c0_20, %c0_21, %c0_22] : memref<1x8x128xf32, #tpu.memory_space<vmem>>, vector<1x8x128xf32>
      tpu.vector_store %arg8[%c0_20, %c0_21, %c0_22], %28 {strides = array<i32>} : memref<1x8x128xf32, #tpu.memory_space<vmem>>, vector<1x8x128xf32>,
      %30 = vector.shape_cast %25 : vector<1x128xf32> to vector<1x1x128xf32>
      %31 = vector.shape_cast %30 : vector<1x1x128xf32> to vector<1x1x128xf32>
      %32 = vector.broadcast %31 : vector<1x1x128xf32> to vector<1x8x128xf32>
      %c0_23 = arith.constant 0 : index
      %c0_24 = arith.constant 0 : index
      %c0_25 = arith.constant 0 : index
      %33 = vector.load %arg9[%c0_23, %c0_24, %c0_25] : memref<1x8x128xf32, #tpu.memory_space<vmem>>, vector<1x8x128xf32>
      tpu.vector_store %arg9[%c0_23, %c0_24, %c0_25], %32 {strides = array<i32>} : memref<1x8x128xf32, #tpu.memory_space<vmem>>, vector<1x8x128xf32>,
    } else {
    }
    return
  }
  func.func @transform_0(%arg0: i32, %arg1: i32, %arg2: i32) -> (i32, i32) {
    %c0_i32 = arith.constant 0 : i32
    return %arg0, %arg2 : i32, i32
  }
  func.func @transform_1(%arg0: i32, %arg1: i32, %arg2: i32) -> (i32, i32) {
    %c0_i32 = arith.constant 0 : i32
    return %arg2, %arg1 : i32, i32
  }
  func.func @transform_2(%arg0: i32, %arg1: i32, %arg2: i32) -> (i32, i32) {
    %c0_i32 = arith.constant 0 : i32
    %c0_i32_0 = arith.constant 0 : i32
    return %c0_i32, %arg1 : i32, i32
  }
  func.func @transform_3(%arg0: i32, %arg1: i32, %arg2: i32) -> (i32, i32) {
    %c0_i32 = arith.constant 0 : i32
    %c0_i32_0 = arith.constant 0 : i32
    return %arg0, %c0_i32 : i32, i32
  }
  func.func @transform_4(%arg0: i32, %arg1: i32, %arg2: i32) -> (i32, i32) {
    %c0_i32 = arith.constant 0 : i32
    return %arg0, %arg1 : i32, i32
  }
  func.func @transform_5(%arg0: i32, %arg1: i32, %arg2: i32) -> (i32, i32, i32) {
    %c0_i32 = arith.constant 0 : i32
    %c0_i32_0 = arith.constant 0 : i32
    return %arg0, %c0_i32, %arg1 : i32, i32, i32
  }
  func.func @transform_6(%arg0: i32, %arg1: i32, %arg2: i32) -> (i32, i32, i32) {
    %c0_i32 = arith.constant 0 : i32
    %c0_i32_0 = arith.constant 0 : i32
    return %arg0, %c0_i32, %arg1 : i32, i32, i32
  }
}

</mosaic_0001>

<bundles_post_ra>
// kernel: conv2d.1
= control target key start
LH: loop header
LB: loop body
LE: loop exit
PB: predicated region body
PF: predicated region fallthrough
CT: control target
= control target key end

     0   :  { %12 = vsyncpa [#allocation4], 0  ;;  %s2721_s0 = inlined_call_operand.vmem [shape: bf16[2048,160], index: 0, kind: input, shape index: {}]   ;;  %s2722_s1 = inlined_call_operand.vmem [shape: bf16[160,128], index: 1, kind: input, shape index: {}]   ;;  %s2723_s2 = inlined_call_operand.vmem [shape: f32[1,128], index: 2, kind: input, shape index: {}]   ;;  %s2724_s3 = inlined_call_operand.vmem [shape: f32[2048,1], index: 3, kind: input, shape index: {}]   ;;  %s2725_s4 = inlined_call_operand.hbm [shape: bf16[2048,128], index: 4, kind: output, shape index: {0}]   ;;  %s2726_s5 = inlined_call_operand.vmem [shape: f32[8,8,128], index: 5, kind: output, shape index: {1}]   ;;  %s2727_s6 = inlined_call_operand.vmem [shape: f32[8,8,128], index: 6, kind: output, shape index: {2}]  }
   0x1   :  { %14 = vsyncpa [#allocation4 + $0x1], 0  ;;  %s2281_s21 = smov 0   ;;  %s2283_s22 = smov 0  }
   0x2   :  { %s2285_s23 = smov 0   ;;  %s2287_s24 = smov 0  }
   0x3   :  { %s2289_s25 = smov 0   ;;  %s2291_s26 = smov 0  }
   0x4 LB: > { %s1784_s27 = sadd.s32 4294967295, %s2240_s26   ;;  %s1785_s28 = sadd.s32 4294967294, %s2240_s26   ;;  %s2240_s26 = sphi %s2291_s26, %s20_s26   ;;  %s2236_s25 = sphi %s2289_s25, %s2734_s25   ;;  %s2232_s24 = sphi %s2287_s24, %s2733_s24   ;;  %s2228_s23 = sphi %s2285_s23, %s2732_s23   ;;  %s2224_s22 = sphi %s2283_s22, %s2731_s22   ;;  %s2220_s21 = sphi %s2281_s21, %s2730_s21  }
   0x5   : > { %s39_s29 = sadd.s32 1, %s2236_s25  ;;  %s156_s30 = sadd.s32 1, %s2228_s23 }
   0x6   : > { %p41_p0 = scmp.ge.s32.totalorder %s39_s29, 8  ;;  %p166_p1 = scmp.ne.s32.totalorder %s2228_s23, %s2224_s22 }
   0x7   : > { %p167_p2 = scmp.eq.s32.totalorder %s1784_s27, 7  ;;  %p172_p3 = scmp.ne.s32.totalorder %s2224_s22, %s2220_s21 }
   0x8   : > { %s2736_s29 = smov (%p41_p0, %s39_s29), 0  ;;  %p173_p5 = scmp.eq.s32.totalorder %s1785_s28, 7 }
   0x9   : > { %p2321_p4 = por %p167_p2, %p166_p1  ;;  %s151_s8 = ssub.s32 %s2236_s25, %s2736_s29 }
   0xa   : > { %p1790_p6 = scmp.ge.s32.totalorder %s2240_s26, 1  ;;  %p154_p7 = scmp.eq.s32.totalorder %s151_s8, 0 }
   0xb   : > { %p2328_p8 = por %p173_p5, %p172_p3  ;;  %p289_p9 = scmp.lt.s32.totalorder %s2240_s26, 9 }
   0xc   : > { %s2334_s10 = scalar_select %p154_p7, %s2228_s23, %s156_s30  }
   0xd   : > { %p290_p10 = pnand %p1790_p6, %p289_p9 }
   0xe   : > { %v2104_v0 = vld [vmem:[%s2722_s1] sm:$0xff] (!%p290_p10)   ;;  %v2242_v1 = vmov (!%p290_p10), 0   ;;  %s1792_s13 = sshll.u32 (!%p290_p10), %s2232_s24, 5  ;;  %v2105_v2 = vld [vmem:[%s2722_s1 + $0x8] sm:$0xff] (!%p290_p10)   ;;  %v2106_v3 = vld [vmem:[%s2722_s1 + $0x10] sm:$0xff] (!%p290_p10)   ;;  %vm724_vm0 = vcmask (!%p290_p10), 261120  }
   0xf   : > { %293 = sbr.rel (%p290_p10) target bundleno = 390 (0x186), region = 36  ;;  %773 = vmatprep.subr.bf16.mxu0 (!%p290_p10), %v2242_v1  ;;  %2024 = vmatprep.subr.bf16.mxu1 (!%p290_p10), %v2242_v1  ;;  %p356_p11 = scmp.lt.s32.totalorder (!%p290_p10), %s1792_s13, 255  ;;  %v2107_v4 = vld [vmem:[%s2722_s1 + $0x18] sm:$0xff] (!%p290_p10)   ;;  %v2108_v7 = vld [vmem:[%s2722_s1 + $0x20] sm:$0xff] (!%p290_p10)   ;;  %v2109_v8 = vld [vmem:[%s2722_s1 + $0x28] sm:$0xff] (!%p290_p10)  }
  0x10   : > { %774 = vmatpush1.bf16.msra.mxu0 (!%p290_p10), %v2104_v0  ;;  %2034 = vmatpush1.bf16.msra.mxu1 (!%p290_p10), %v2104_v0  ;;  %v2110_v9 = vld [vmem:[%s2722_s1 + $0x30] sm:$0xff] (!%p290_p10)   ;;  %v2111_v10 = vld [vmem:[%s2722_s1 + $0x38] sm:$0xff] (!%p290_p10)   ;;  %v2112_v12 = vld [vmem:[%s2722_s1 + $0x40] sm:$0xff] (!%p290_p10)   ;;  %s333_s15 = sand.u32 (!%p290_p10), 1, %s2224_s22   ;;  %s1928_s17 = sshll.u32 (!%p290_p10), %s2232_s24, 11 }
  0x11   : > { %775 = vmatprep.subr.bf16.mxu0 (!%p290_p10), %v2242_v1  ;;  %2025 = vmatprep.subr.bf16.mxu1 (!%p290_p10), %v2242_v1  ;;  %v2113_v16 = vld [vmem:[%s2722_s1 + $0x48] sm:$0xff] (!%p290_p10)   ;;  %s2636_s30 = scalar_lea.hbm (!%p290_p10), %s2725_s4, %s1928_s17  ;;  %s2243_s8 = smov (!%p290_p10), [#allocation3]  }
  0x12   : > { %2102 = vset.pattern.permute.xlu0 (!%p290_p10), %v2242_v1  ;;  %2103 = vset.pattern.permute.xlu1 (!%p290_p10), %v2242_v1  ;;  %s2166_s11 = sshll.u32 (!%p290_p10), %s2243_s8, 4  ;;  %s2167_s11 = int_to_ptr.vmem [resolvable:$false] %s2166_s11 }
  0x13   : > { %s2168_s12 = scalar_lea.vmem (!%p290_p10), %s2167_s11, 4096 }
  0x14   : > { %776 = vmatpush1.bf16.msra.mxu0 (!%p290_p10), %v2105_v2  ;;  %2035 = vmatpush1.bf16.msra.mxu1 (!%p290_p10), %v2105_v2 }
  0x15   : > { %777 = vmatprep.subr.bf16.mxu0 (!%p290_p10), %v2242_v1  ;;  %2026 = vmatprep.subr.bf16.mxu1 (!%p290_p10), %v2242_v1 }
  0x16   : > { %s2738_s13 = smov (!%p356_p11, %s1792_s13), 255 }
  0x17   : > { %s1895_s18 = sshll.u32 %s2738_s13, 3  ;;  %s2650_s13 = scalar_lea.sflag [#allocation4], %s333_s15 }
  0x18   : > { %s2362_s27 = scalar_lea.vmem %s2721_s0, %s1895_s18  ;;  %778 = vmatpush1.bf16.msra.mxu0 %v2106_v3  ;;  %2036 = vmatpush1.bf16.msra.mxu1 %v2106_v3  ;;  %s2393_s20 = scalar_lea.vmem %s2724_s3, %s1895_s18 }
  0x19   : > { %779 = vmatprep.subr.bf16.mxu0 %v2242_v1  ;;  %2027 = vmatprep.subr.bf16.mxu1 %v2242_v1  ;;  %v2116_v5 = vld [vmem:[%s2362_s27 + $0x4] ss:$8 sps:$4 sm:$0xff]   ;;  %v1234_v13 = vld [vmem:[%s2393_s20 + $0x10] sm:$0xff]  ;;  %v1235_v15 = vld [vmem:[%s2393_s20 + $0x18] sm:$0xff] }
  0x1a   : > { %v2119_v6 = vld [vmem:[%s2362_s27 + $0x84] ss:$8 sps:$4 sm:$0xff]   ;;  %1841 = vmatprep.mubr.msk.bf16.mxu0 %vm724_vm0, %v2116_v5  ;;  %1276 = vperm.xlu1 %2103, %v1234_v13   ;;  %v2114_v18 = vld [vmem:[%s2362_s27] ss:$8 sps:$4 sm:$0xff]   ;;  %v2120_v21 = vld [vmem:[%s2362_s27 + $0x14] ss:$8 sps:$4 sm:$0xff]  }
  0x1b   : > { %1849 = vmatprep.mubr.msk.bf16.mxu1 %vm724_vm0, %v2119_v6  ;;  %v1232_v11 = vld [vmem:[%s2393_s20] sm:$0xff]  ;;  %v1233_v14 = vld [vmem:[%s2393_s20 + $0x8] sm:$0xff]  ;;  %v2122_v22 = vld [vmem:[%s2362_s27 + $0x94] ss:$8 sps:$4 sm:$0xff]  }
  0x1c   : > { %780 = vmatpush1.bf16.msra.mxu0 %v2107_v4  ;;  %2037 = vmatpush1.bf16.msra.mxu1 %v2107_v4  ;;  %v1236_v17 = vld [vmem:[%s2393_s20 + $0x20] sm:$0xff]  ;;  %v1237_v20 = vld [vmem:[%s2393_s20 + $0x28] sm:$0xff]  ;;  %v1238_v23 = vld [vmem:[%s2393_s20 + $0x30] sm:$0xff] }
  0x1d   : > { %781 = vmatprep.subr.bf16.mxu0 %v2242_v1  ;;  %2028 = vmatprep.subr.bf16.mxu1 %v2242_v1  ;;  %v2117_v19 = vld [vmem:[%s2362_s27 + $0x80] ss:$8 sps:$4 sm:$0xff]   ;;  %v1239_v24 = vld [vmem:[%s2393_s20 + $0x38] sm:$0xff]  ;;  %v2126_v29 = vld [vmem:[%s2362_s27 + $0x24] ss:$8 sps:$4 sm:$0xff]  }
  0x1e   : > { %1266 = vperm.xlu0 %2102, %v1232_v11   ;;  %1281 = vperm.xlu1 %2103, %v1235_v15   ;;  %v1240_v25 = vld [vmem:[%s2393_s20 + $0x40] sm:$0xff]  ;;  %v2124_v26 = vld [vmem:[%s2362_s27 + $0x10] ss:$8 sps:$4 sm:$0xff]   ;;  %v1241_v28 = vld [vmem:[%s2393_s20 + $0x48] sm:$0xff] }
  0x1f   : > { %v2125_v27 = vld [vmem:[%s2362_s27 + $0x90] ss:$8 sps:$4 sm:$0xff]   ;;  %v2128_v30 = vld [vmem:[%s2362_s27 + $0xa4] ss:$8 sps:$4 sm:$0xff]   ;;  %v2130_v34 = vld [vmem:[%s2362_s27 + $0x20] ss:$8 sps:$4 sm:$0xff]  }
  0x20   : > { %782 = vmatpush1.bf16.msra.mxu0 %v2108_v7  ;;  %2038 = vmatpush1.bf16.msra.mxu1 %v2108_v7  ;;  %v1242_v31 = vld [vmem:[%s2393_s20 + $0x50] sm:$0xff]  ;;  %v1243_v32 = vld [vmem:[%s2393_s20 + $0x58] sm:$0xff]  ;;  %v1244_v33 = vld [vmem:[%s2393_s20 + $0x60] sm:$0xff] }
  0x21   : > { %783 = vmatprep.subr.bf16.mxu0 %v2242_v1  ;;  %2029 = vmatprep.subr.bf16.mxu1 %v2242_v1  ;;  %v2131_v35 = vld [vmem:[%s2362_s27 + $0xa0] ss:$8 sps:$4 sm:$0xff]   ;;  %v2132_v37 = vld [vmem:[%s2362_s27 + $0x34] ss:$8 sps:$4 sm:$0xff]   ;;  %v2136_v42 = vld [vmem:[%s2362_s27 + $0x30] ss:$8 sps:$4 sm:$0xff]  }
  0x22   : > { %1271 = vperm.xlu0 %2102, %v1233_v14   ;;  %1291 = vperm.xlu1 %2103, %v1237_v20   ;;  %v1245_v36 = vld [vmem:[%s2393_s20 + $0x68] sm:$0xff]  ;;  %v2134_v38 = vld [vmem:[%s2362_s27 + $0xb4] ss:$8 sps:$4 sm:$0xff]   ;;  %v1248_v41 = vld [vmem:[%s2393_s20 + $0x80] sm:$0xff] }
  0x23   : > { %v1246_v39 = vld [vmem:[%s2393_s20 + $0x70] sm:$0xff]  ;;  %v1247_v40 = vld [vmem:[%s2393_s20 + $0x78] sm:$0xff]  ;;  %v1249_v44 = vld [vmem:[%s2393_s20 + $0x88] sm:$0xff] }
  0x24   : > { %784 = vmatpush1.bf16.msra.mxu0 %v2109_v8  ;;  %2039 = vmatpush1.bf16.msra.mxu1 %v2109_v8  ;;  %v2137_v43 = vld [vmem:[%s2362_s27 + $0xb0] ss:$8 sps:$4 sm:$0xff]   ;;  %v2138_v45 = vld [vmem:[%s2362_s27 + $0x44] ss:$8 sps:$4 sm:$0xff]   ;;  %v2142_v50 = vld [vmem:[%s2362_s27 + $0x40] ss:$8 sps:$4 sm:$0xff]  }
  0x25   : > { %785 = vmatprep.subr.bf16.mxu0 %v2242_v1  ;;  %2030 = vmatprep.subr.bf16.mxu1 %v2242_v1  ;;  %v2140_v46 = vld [vmem:[%s2362_s27 + $0xc4] ss:$8 sps:$4 sm:$0xff]   ;;  %v1250_v47 = vld [vmem:[%s2393_s20 + $0x90] sm:$0xff]  ;;  %v1251_v48 = vld [vmem:[%s2393_s20 + $0x98] sm:$0xff] }
  0x26   : > { %1286 = vperm.xlu0 %2102, %v1236_v17   ;;  %1301 = vperm.xlu1 %2103, %v1239_v24   ;;  %v1252_v49 = vld [vmem:[%s2393_s20 + $0xa0] sm:$0xff]  ;;  %v1253_v52 = vld [vmem:[%s2393_s20 + $0xa8] sm:$0xff]  ;;  %v2144_v53 = vld [vmem:[%s2362_s27 + $0x54] ss:$8 sps:$4 sm:$0xff]  }
  0x27   : > { %v2143_v51 = vld [vmem:[%s2362_s27 + $0xc0] ss:$8 sps:$4 sm:$0xff]   ;;  %v2146_v54 = vld [vmem:[%s2362_s27 + $0xd4] ss:$8 sps:$4 sm:$0xff]   ;;  %v2148_v58 = vld [vmem:[%s2362_s27 + $0x50] ss:$8 sps:$4 sm:$0xff]  }
  0x28   : > { %786 = vmatpush1.bf16.msra.mxu0 %v2110_v9  ;;  %2040 = vmatpush1.bf16.msra.mxu1 %v2110_v9  ;;  %v1254_v55 = vld [vmem:[%s2393_s20 + $0xb0] sm:$0xff]  ;;  %v1255_v56 = vld [vmem:[%s2393_s20 + $0xb8] sm:$0xff]  ;;  %v1256_v57 = vld [vmem:[%s2393_s20 + $0xc0] sm:$0xff] }
  0x29   : > { %787 = vmatprep.subr.bf16.mxu0 %v2242_v1  ;;  %2031 = vmatprep.subr.bf16.mxu1 %v2242_v1  ;;  %v2149_v59 = vld [vmem:[%s2362_s27 + $0xd0] ss:$8 sps:$4 sm:$0xff]   ;;  %v1257_v60 = vld [vmem:[%s2393_s20 + $0xc8] sm:$0xff]  ;;  %v2156_v5 = vld [vmem:[%s2362_s27 + $0x74] ss:$8 sps:$4 sm:$0xff]  }
  0x2a   : > { %1296 = vperm.xlu0 %2102, %v1238_v23   ;;  %1311 = vperm.xlu1 %2103, %v1241_v28   ;;  %v2150_v61 = vld [vmem:[%s2362_s27 + $0x64] ss:$8 sps:$4 sm:$0xff]   ;;  %v1258_v63 = vld [vmem:[%s2393_s20 + $0xd0] sm:$0xff]  ;;  %v1259_v0 = vld [vmem:[%s2393_s20 + $0xd8] sm:$0xff] }
  0x2b   : > { %v2152_v62 = vld [vmem:[%s2362_s27 + $0xe4] ss:$8 sps:$4 sm:$0xff]   ;;  %v2154_v2 = vld [vmem:[%s2362_s27 + $0x60] ss:$8 sps:$4 sm:$0xff]   ;;  %v2158_v6 = vld [vmem:[%s2362_s27 + $0xf4] ss:$8 sps:$4 sm:$0xff]  }
  0x2c   : > { %788 = vmatpush1.bf16.msra.mxu0 %v2111_v10  ;;  %2041 = vmatpush1.bf16.msra.mxu1 %v2111_v10  ;;  %v2155_v3 = vld [vmem:[%s2362_s27 + $0xe0] ss:$8 sps:$4 sm:$0xff]   ;;  %v1262_v7 = vld [vmem:[%s2393_s20 + $0xf0] sm:$0xff]  ;;  %v1263_v8 = vld [vmem:[%s2393_s20 + $0xf8] sm:$0xff] }
  0x2d   : > { %789 = vmatprep.subr.bf16.mxu0 %v2242_v1  ;;  %2032 = vmatprep.subr.bf16.mxu1 %v2242_v1  ;;  %v1261_v4 = vld [vmem:[%s2393_s20 + $0xe8] sm:$0xff]  ;;  %v2160_v9 = vld [vmem:[%s2362_s27 + $0x70] ss:$8 sps:$4 sm:$0xff]  }
  0x2e   : > { %1306 = vperm.xlu0 %2102, %v1240_v25   ;;  %1321 = vperm.xlu1 %2103, %v1243_v32   ;;  %v2161_v10 = vld [vmem:[%s2362_s27 + $0xf0] ss:$8 sps:$4 sm:$0xff]   ;;  %s1791_s27 = sshll.u32 %s333_s15, 7 }
  0x2f   : > { %s2514_s16 = scalar_lea.vmem [#allocation3], %s1791_s27 }
  0x30   : > { %790 = vmatpush1.bf16.msra.mxu0 %v2112_v12  ;;  %2042 = vmatpush1.bf16.msra.mxu1 %v2112_v12  ;;  %s1593_s19 = sshll.u32 %s2514_s16, 4  ;;  %s2638_s19 = int_to_ptr.vmem [resolvable:$true] %s1593_s19 }
  0x31   : > { %791 = vmatprep.subr.bf16.mxu0 %v2242_v1  ;;  %2033 = vmatprep.subr.bf16.mxu1 %v2242_v1  ;;  %v1260_v1 = vld [vmem:[%s2393_s20 + $0xe0] sm:$0xff]  ;;  %s2162_s18 = scalar_lea.vmem %s2638_s19, 2048  ;;  %p2169_p1 = scmp.lt.s32.totalorder %s2638_s19, %s2167_s11 }
  0x32   : > { %1316 = vperm.xlu0 %2102, %v1242_v31   ;;  %1331 = vperm.xlu1 %2103, %v1245_v36   ;;  %p2163_p12 = scmp.ne.s32.totalorder %s2638_s19, %s2162_s18  ;;  %p2170_p2 = scmp.lt.s32.totalorder %s2168_s12, %s2162_s18 }
  0x34   : > { %792 = vmatpush1.bf16.msra.mxu0 %v2113_v16  ;;  %2043 = vmatpush1.bf16.msra.mxu1 %v2113_v16  ;;  %v2491_v16 = vld [vmem:[%s2723_s2] ss:$0 sm:$0xff]  ;;  %p2164_p13 = pnand %p2163_p12, %p2321_p4  ;;  %p2171_p3 = por %p2170_p2, %p2169_p1 }
  0x36   : > { %1326 = vperm.xlu0 %2102, %v1244_v33   ;;  %1341 = vperm.xlu1 %2103, %v1247_v40   ;;  %p2165_p0 = pneg %p2164_p13 }
  0x37   : > { %806 = vmatmul.mubr.bf16.vlgmr.msra.gmra.mrb[0].mxu0 %v2114_v18  ;;  %870 = vmatmul.mubr.bf16.vlgmr.msra.gmra.mrb[0].mxu1 %v2117_v19 }
  0x38   : > { %1842 = vmatprep.mubr.msk.bf16.mxu0 %vm724_vm0, %v2120_v21  ;;  %1850 = vmatprep.mubr.msk.bf16.mxu1 %vm724_vm0, %v2122_v22  ;;  %p2172_p5 = pnand %p2171_p3, %p2165_p0 }
  0x3a   : > { %1336 = vperm.xlu0 %2102, %v1246_v39   ;;  %1351 = vperm.xlu1 %2103, %v1249_v44  }
  0x3e   : > { %1346 = vperm.xlu0 %2102, %v1248_v41   ;;  %1361 = vperm.xlu1 %2103, %v1251_v48  }
  0x3f   : > { %814 = vmatmul.mubr.bf16.gmra.mrb[4].mxu0 %v2124_v26  ;;  %878 = vmatmul.mubr.bf16.gmra.mrb[4].mxu1 %v2125_v27 }
  0x40   : > { %1843 = vmatprep.mubr.msk.bf16.mxu0 %vm724_vm0, %v2126_v29  ;;  %1851 = vmatprep.mubr.msk.bf16.mxu1 %vm724_vm0, %v2128_v30 }
  0x42   : > { %1356 = vperm.xlu0 %2102, %v1250_v47   ;;  %1371 = vperm.xlu1 %2103, %v1253_v52  }
  0x46   : > { %1366 = vperm.xlu0 %2102, %v1252_v49   ;;  %1381 = vperm.xlu1 %2103, %v1255_v56  }
  0x47   : > { %822 = vmatmul.mubr.bf16.gmra.mrb[8].mxu0 %v2130_v34  ;;  %886 = vmatmul.mubr.bf16.gmra.mrb[8].mxu1 %v2131_v35 }
  0x48   : > { %1844 = vmatprep.mubr.msk.bf16.mxu0 %vm724_vm0, %v2132_v37  ;;  %1852 = vmatprep.mubr.msk.bf16.mxu1 %vm724_vm0, %v2134_v38 }
  0x4a   : > { %1376 = vperm.xlu0 %2102, %v1254_v55   ;;  %1391 = vperm.xlu1 %2103, %v1257_v60  }
  0x4e   : > { %1386 = vperm.xlu0 %2102, %v1256_v57   ;;  %1401 = vperm.xlu1 %2103, %v1259_v0  }
  0x4f   : > { %830 = vmatmul.mubr.bf16.gmra.mrb[12].mxu0 %v2136_v42  ;;  %894 = vmatmul.mubr.bf16.gmra.mrb[12].mxu1 %v2137_v43 }
  0x50   : > { %1845 = vmatprep.mubr.msk.bf16.mxu0 %vm724_vm0, %v2138_v45  ;;  %1853 = vmatprep.mubr.msk.bf16.mxu1 %vm724_vm0, %v2140_v46 }
  0x52   : > { %1396 = vperm.xlu0 %2102, %v1258_v63   ;;  %1411 = vperm.xlu1 %2103, %v1261_v4  }
  0x56   : > { %1406 = vperm.xlu0 %2102, %v1260_v1   ;;  %1421 = vperm.xlu1 %2103, %v1263_v8  }
  0x57   : > { %838 = vmatmul.mubr.bf16.gmra.mrb[16].mxu0 %v2142_v50  ;;  %902 = vmatmul.mubr.bf16.gmra.mrb[16].mxu1 %v2143_v51 }
  0x58   : > { %1846 = vmatprep.mubr.msk.bf16.mxu0 %vm724_vm0, %v2144_v53  ;;  %1854 = vmatprep.mubr.msk.bf16.mxu1 %vm724_vm0, %v2146_v54 }
  0x5a   : > { %1416 = vperm.xlu0 %2102, %v1262_v7  }
  0x5f   : > { %846 = vmatmul.mubr.bf16.gmra.mrb[20].mxu0 %v2148_v58  ;;  %910 = vmatmul.mubr.bf16.gmra.mrb[20].mxu1 %v2149_v59 }
  0x60   : > { %1847 = vmatprep.mubr.msk.bf16.mxu0 %vm724_vm0, %v2150_v61  ;;  %1855 = vmatprep.mubr.msk.bf16.mxu1 %vm724_vm0, %v2152_v62 }
  0x67   : > { %854 = vmatmul.mubr.bf16.gmra.mrb[24].mxu0 %v2154_v2  ;;  %918 = vmatmul.mubr.bf16.gmra.mrb[24].mxu1 %v2155_v3 }
  0x68   : > { %1848 = vmatprep.mubr.msk.bf16.mxu0 %vm724_vm0, %v2156_v5  ;;  %1856 = vmatprep.mubr.msk.bf16.mxu1 %vm724_vm0, %v2158_v6 }
  0x6f   : > { %862 = vmatmul.mubr.bf16.gmra.mrb[28].mxu0 %v2160_v9  ;;  %926 = vmatmul.mubr.bf16.gmra.mrb[28].mxu1 %v2161_v10 }
  0x99   : > { %v1277_v12 = vpop.permute.xlu1 %1276 }
  0x9d   : > { %v1267_v11 = vpop.permute.xlu0 %1266  ;;  %v1282_v14 = vpop.permute.xlu1 %1281 }
  0xa1   : > { %v1272_v13 = vpop.permute.xlu0 %1271  ;;  %v2494_v17 = vpop.permute.xlu1 %1291 }
  0xa5   : > { %v2486_v15 = vpop.permute.xlu0 %1286  ;;  %v2510_v35 = vpop.permute.xlu1 %1301 }
  0xa9   : > { %v2496_v18 = vpop.permute.xlu0 %1296  ;;  %v2528_v59 = vpop.permute.xlu1 %1311 }
  0xad   : > { %v2512_v36 = vpop.permute.xlu0 %1306 }
  0xb1   : > { %v2530_v60 = vpop.permute.xlu0 %1316 }
 0x10a   : > { %v807_v19 = vpop.f32.mrb[0].mxu0  ;;  %v871_v20 = vpop.f32.mrb[0].mxu1 }
 0x10b   : > { %v1040_v21 = vadd.f32 %v2491_v16, %v807_v19  ;;  %v809_v22 = vpop.f32.mrb[1].mxu0  ;;  %v873_v23 = vpop.f32.mrb[1].mxu1  ;;  %v2503_v30 = vadd.f32 %v2491_v16, %v871_v20 }
 0x10c   : > { %v810_v24 = vpop.f32.mrb[2].mxu0  ;;  %v874_v25 = vpop.f32.mrb[2].mxu1 }
 0x10d   : > { %v1424_v26 = vmul.f32 %v1267_v11, %v1040_v21  ;;  %v1041_v27 = vadd.f32 %v2491_v16, %v810_v24  ;;  %v812_v28 = vpop.f32.mrb[3].mxu0  ;;  %v876_v29 = vpop.f32.mrb[3].mxu1  ;;  %v2506_v31 = vadd.f32 %v2491_v16, %v874_v25 }
 0x10e   : > { %v2548_v23 = vpop.permute.xlu0 %1326 }
 0x10f   : > { %v1932_v32 = vpack.c.bf16 %v1041_v27, %v1040_v21  ;;  %v1425_v33 = vmul.f32 %v1272_v13, %v1041_v27  ;;  %v1972_v34 = vpack.c.bf16 %v2506_v31, %v2503_v30  ;;  %v1493_v37 = vmul.f32 %v1424_v26, %v1424_v26 }
 0x111   : > { %1933 = vst [vmem:[%s2514_s16] sm:$0xff] %v1932_v32   ;;  %v1456_v38 = vadd.f32 %v1425_v33, %v1424_v26  ;;  %v1494_v39 = vmul.f32 %v1425_v33, %v1425_v33  ;;  %2016 = vst [vmem:[%s2514_s16 + $0x40] sm:$0xff] %v1972_v34  }
 0x112   : > { %v815_v40 = vpop.f32.mrb[4].mxu0  ;;  %v879_v41 = vpop.f32.mrb[4].mxu1 }
 0x113   : > { %v1525_v42 = vadd.f32 %v1494_v39, %v1493_v37  ;;  %v1042_v43 = vadd.f32 %v2491_v16, %v815_v40  ;;  %v817_v44 = vpop.f32.mrb[5].mxu0  ;;  %v881_v45 = vpop.f32.mrb[5].mxu1  ;;  %v2521_v52 = vadd.f32 %v2491_v16, %v879_v41 }
 0x114   : > { %v818_v46 = vpop.f32.mrb[6].mxu0  ;;  %v882_v47 = vpop.f32.mrb[6].mxu1 }
 0x115   : > { %v1426_v48 = vmul.f32 %v1277_v12, %v1042_v43  ;;  %v1043_v49 = vadd.f32 %v2491_v16, %v818_v46  ;;  %v820_v50 = vpop.f32.mrb[7].mxu0  ;;  %v884_v51 = vpop.f32.mrb[7].mxu1  ;;  %v2524_v53 = vadd.f32 %v2491_v16, %v882_v47 }
 0x117   : > { %v1457_v54 = vadd.f32 %v1456_v38, %v1426_v48  ;;  %v1495_v55 = vmul.f32 %v1426_v48, %v1426_v48  ;;  %v1937_v56 = vpack.c.bf16 %v1043_v49, %v1042_v43  ;;  %v1427_v57 = vmul.f32 %v1282_v14, %v1043_v49  ;;  %v2566_v49 = vpop.permute.xlu0 %1336 }
 0x118   : > { %v1977_v58 = vpack.c.bf16 %v2524_v53, %v2521_v52 }
 0x119   : > { %v1526_v61 = vadd.f32 %v1525_v42, %v1495_v55  ;;  %2009 = vst [vmem:[%s2514_s16 + $0x8] sm:$0xff] %v1937_v56   ;;  %v1458_v62 = vadd.f32 %v1457_v54, %v1427_v57  ;;  %v1496_v63 = vmul.f32 %v1427_v57, %v1427_v57 }
 0x11a   : > { %v823_v0 = vpop.f32.mrb[8].mxu0  ;;  %2017 = vst [vmem:[%s2514_s16 + $0x48] sm:$0xff] %v1977_v58   ;;  %v887_v1 = vpop.f32.mrb[8].mxu1 }
 0x11b   : > { %v1527_v2 = vadd.f32 %v1526_v61, %v1496_v63  ;;  %v1044_v3 = vadd.f32 %v2491_v16, %v823_v0  ;;  %v825_v4 = vpop.f32.mrb[9].mxu0  ;;  %v889_v5 = vpop.f32.mrb[9].mxu1  ;;  %v2538_v12 = vadd.f32 %v2491_v16, %v887_v1 }
 0x11c   : > { %v826_v6 = vpop.f32.mrb[10].mxu0  ;;  %v890_v7 = vpop.f32.mrb[10].mxu1 }
 0x11d   : > { %v1428_v8 = vmul.f32 %v2486_v15, %v1044_v3  ;;  %v1045_v9 = vadd.f32 %v2491_v16, %v826_v6  ;;  %v828_v10 = vpop.f32.mrb[11].mxu0  ;;  %v892_v11 = vpop.f32.mrb[11].mxu1  ;;  %v2541_v13 = vadd.f32 %v2491_v16, %v890_v7 }
 0x11e   : > { %v2546_v15 = vpop.permute.xlu1 %1321  ;;  %v2584_v11 = vpop.permute.xlu0 %1346 }
 0x11f   : > { %v1459_v14 = vadd.f32 %v1458_v62, %v1428_v8  ;;  %v1497_v19 = vmul.f32 %v1428_v8, %v1428_v8  ;;  %v1942_v20 = vpack.c.bf16 %v1045_v9, %v1044_v3  ;;  %v1429_v21 = vmul.f32 %v2494_v17, %v1045_v9 }
 0x120   : > { %v1982_v22 = vpack.c.bf16 %v2541_v13, %v2538_v12 }
 0x121   : > { %v1528_v24 = vadd.f32 %v1527_v2, %v1497_v19  ;;  %2010 = vst [vmem:[%s2514_s16 + $0x10] sm:$0xff] %v1942_v20   ;;  %v1460_v25 = vadd.f32 %v1459_v14, %v1429_v21  ;;  %v1498_v26 = vmul.f32 %v1429_v21, %v1429_v21 }
 0x122   : > { %v831_v27 = vpop.f32.mrb[12].mxu0  ;;  %2018 = vst [vmem:[%s2514_s16 + $0x50] sm:$0xff] %v1982_v22   ;;  %v895_v28 = vpop.f32.mrb[12].mxu1 }
 0x123   : > { %v1529_v29 = vadd.f32 %v1528_v24, %v1498_v26  ;;  %v1046_v32 = vadd.f32 %v2491_v16, %v831_v27  ;;  %v833_v33 = vpop.f32.mrb[13].mxu0  ;;  %v897_v34 = vpop.f32.mrb[13].mxu1  ;;  %v2556_v42 = vadd.f32 %v2491_v16, %v895_v28 }
 0x124   : > { %v834_v17 = vpop.f32.mrb[14].mxu0  ;;  %v898_v37 = vpop.f32.mrb[14].mxu1 }
 0x125   : > { %v1430_v38 = vmul.f32 %v2496_v18, %v1046_v32  ;;  %v1047_v39 = vadd.f32 %v2491_v16, %v834_v17  ;;  %v836_v40 = vpop.f32.mrb[15].mxu0  ;;  %v900_v41 = vpop.f32.mrb[15].mxu1  ;;  %v2559_v43 = vadd.f32 %v2491_v16, %v898_v37 }
 0x126   : > { %v2564_v18 = vpop.permute.xlu1 %1331 }
 0x127   : > { %v1461_v44 = vadd.f32 %v1460_v25, %v1430_v38  ;;  %v1499_v45 = vmul.f32 %v1430_v38, %v1430_v38  ;;  %v1947_v46 = vpack.c.bf16 %v1047_v39, %v1046_v32  ;;  %v1431_v47 = vmul.f32 %v2510_v35, %v1047_v39 }
 0x128   : > { %v1987_v48 = vpack.c.bf16 %v2559_v43, %v2556_v42 }
 0x129   : > { %v1530_v50 = vadd.f32 %v1529_v29, %v1499_v45  ;;  %2011 = vst [vmem:[%s2514_s16 + $0x18] sm:$0xff] %v1947_v46   ;;  %v1462_v51 = vadd.f32 %v1461_v44, %v1431_v47  ;;  %v1500_v54 = vmul.f32 %v1431_v47, %v1431_v47  ;;  %v2600_v45 = vpop.permute.xlu0 %1356 }
 0x12a   : > { %2019 = vst [vmem:[%s2514_s16 + $0x58] sm:$0xff] %v1987_v48   ;;  %v839_v55 = vpop.f32.mrb[16].mxu0  ;;  %v903_v56 = vpop.f32.mrb[16].mxu1 }
 0x12b   : > { %v1531_v57 = vadd.f32 %v1530_v50, %v1500_v54  ;;  %v1048_v58 = vadd.f32 %v2491_v16, %v839_v55  ;;  %v841_v61 = vpop.f32.mrb[17].mxu0  ;;  %v905_v62 = vpop.f32.mrb[17].mxu1  ;;  %v2574_v4 = vadd.f32 %v2491_v16, %v903_v56 }
 0x12c   : > { %v842_v35 = vpop.f32.mrb[18].mxu0  ;;  %v906_v63 = vpop.f32.mrb[18].mxu1 }
 0x12d   : > { %v1432_v0 = vmul.f32 %v2512_v36, %v1048_v58  ;;  %v1049_v1 = vadd.f32 %v2491_v16, %v842_v35  ;;  %v844_v2 = vpop.f32.mrb[19].mxu0  ;;  %v908_v3 = vpop.f32.mrb[19].mxu1  ;;  %v2577_v5 = vadd.f32 %v2491_v16, %v906_v63 }
 0x12e   : > { %v2582_v36 = vpop.permute.xlu1 %1341 }
 0x12f   : > { %v1463_v6 = vadd.f32 %v1462_v51, %v1432_v0  ;;  %v1501_v7 = vmul.f32 %v1432_v0, %v1432_v0  ;;  %v1952_v8 = vpack.c.bf16 %v1049_v1, %v1048_v58  ;;  %v1433_v9 = vmul.f32 %v2528_v59, %v1049_v1 }
 0x130   : > { %v1992_v10 = vpack.c.bf16 %v2577_v5, %v2574_v4 }
 0x131   : > { %v1532_v14 = vadd.f32 %v1531_v57, %v1501_v7  ;;  %2012 = vst [vmem:[%s2514_s16 + $0x20] sm:$0xff] %v1952_v8   ;;  %v1464_v19 = vadd.f32 %v1463_v6, %v1433_v9  ;;  %v1502_v20 = vmul.f32 %v1433_v9, %v1433_v9  ;;  %v2618_v9 = vpop.permute.xlu0 %1366 }
 0x132   : > { %2020 = vst [vmem:[%s2514_s16 + $0x60] sm:$0xff] %v1992_v10   ;;  %v847_v21 = vpop.f32.mrb[20].mxu0  ;;  %v911_v22 = vpop.f32.mrb[20].mxu1 }
 0x133   : > { %v1050_v24 = vadd.f32 %v2491_v16, %v847_v21  ;;  %v849_v25 = vpop.f32.mrb[21].mxu0  ;;  %v913_v26 = vpop.f32.mrb[21].mxu1  ;;  %v1533_v27 = vadd.f32 %v1532_v14, %v1502_v20  ;;  %v2592_v17 = vadd.f32 %v2491_v16, %v911_v22 }
 0x134   : > { %v850_v59 = vpop.f32.mrb[22].mxu0  ;;  %v914_v28 = vpop.f32.mrb[22].mxu1 }
 0x135   : > { %v1434_v29 = vmul.f32 %v2530_v60, %v1050_v24  ;;  %v1051_v32 = vadd.f32 %v2491_v16, %v850_v59  ;;  %v852_v33 = vpop.f32.mrb[23].mxu0  ;;  %v916_v34 = vpop.f32.mrb[23].mxu1  ;;  %v2595_v37 = vadd.f32 %v2491_v16, %v914_v28 }
 0x136   : > { %v1352_v60 = vpop.permute.xlu1 %1351 }
 0x137   : > { %v1465_v38 = vadd.f32 %v1464_v19, %v1434_v29  ;;  %v1503_v39 = vmul.f32 %v1434_v29, %v1434_v29  ;;  %v1957_v40 = vpack.c.bf16 %v1051_v32, %v1050_v24  ;;  %v1435_v41 = vmul.f32 %v2546_v15, %v1051_v32 }
 0x138   : > { %v1997_v44 = vpack.c.bf16 %v2595_v37, %v2592_v17 }
 0x139   : > { %v1534_v46 = vadd.f32 %v1533_v27, %v1503_v39  ;;  %2013 = vst [vmem:[%s2514_s16 + $0x28] sm:$0xff] %v1957_v40   ;;  %v1466_v47 = vadd.f32 %v1465_v38, %v1435_v41  ;;  %v1504_v48 = vmul.f32 %v1435_v41, %v1435_v41 }
 0x13a   : > { %2021 = vst [vmem:[%s2514_s16 + $0x68] sm:$0xff] %v1997_v44   ;;  %v855_v50 = vpop.f32.mrb[24].mxu0  ;;  %v919_v51 = vpop.f32.mrb[24].mxu1 }
 0x13b   : > { %v1052_v54 = vadd.f32 %v2491_v16, %v855_v50  ;;  %v857_v55 = vpop.f32.mrb[25].mxu0  ;;  %v921_v56 = vpop.f32.mrb[25].mxu1  ;;  %v1535_v57 = vadd.f32 %v1534_v46, %v1504_v48  ;;  %v2608_v0 = vadd.f32 %v2491_v16, %v919_v51 }
 0x13c   : > { %v858_v58 = vpop.f32.mrb[26].mxu0  ;;  %v922_v15 = vpop.f32.mrb[26].mxu1 }
 0x13d   : > { %v1436_v61 = vmul.f32 %v2548_v23, %v1052_v54  ;;  %v1053_v62 = vadd.f32 %v2491_v16, %v858_v58  ;;  %v860_v35 = vpop.f32.mrb[27].mxu0  ;;  %v924_v63 = vpop.f32.mrb[27].mxu1  ;;  %v2611_v1 = vadd.f32 %v2491_v16, %v922_v15 }
 0x13e   : > { %v2616_v23 = vpop.permute.xlu1 %1361  ;;  %v1377_v51 = vpop.permute.xlu0 %1376 }
 0x13f   : > { %v1467_v2 = vadd.f32 %v1466_v47, %v1436_v61  ;;  %v1505_v3 = vmul.f32 %v1436_v61, %v1436_v61  ;;  %v1962_v6 = vpack.c.bf16 %v1053_v62, %v1052_v54  ;;  %v1437_v7 = vmul.f32 %v2564_v18, %v1053_v62 }
 0x140   : > { %v2002_v8 = vpack.c.bf16 %v2611_v1, %v2608_v0  ;;  %v1441_v47 = vmul.f32 %v1352_v60, %v2506_v31 }
 0x141   : > { %v1536_v10 = vadd.f32 %v1535_v57, %v1505_v3  ;;  %2014 = vst [vmem:[%s2514_s16 + $0x30] sm:$0xff] %v1962_v6   ;;  %v1468_v14 = vadd.f32 %v1467_v2, %v1437_v7  ;;  %v1506_v19 = vmul.f32 %v1437_v7, %v1437_v7 }
 0x142   : > { %2022 = vst [vmem:[%s2514_s16 + $0x70] sm:$0xff] %v2002_v8   ;;  %v863_v20 = vpop.f32.mrb[28].mxu0  ;;  %v927_v21 = vpop.f32.mrb[28].mxu1 }
 0x143   : > { %v1054_v22 = vadd.f32 %v2491_v16, %v863_v20  ;;  %v865_v24 = vpop.f32.mrb[29].mxu0  ;;  %v929_v18 = vpop.f32.mrb[29].mxu1  ;;  %v1537_v25 = vadd.f32 %v1536_v10, %v1506_v19  ;;  %v2628_v33 = vadd.f32 %v2491_v16, %v927_v21 }
 0x144   : > { %v866_v26 = vpop.f32.mrb[30].mxu0  ;;  %v930_v27 = vpop.f32.mrb[30].mxu1 }
 0x145   : > { %v1438_v59 = vmul.f32 %v2566_v49, %v1054_v22  ;;  %v1055_v28 = vadd.f32 %v2491_v16, %v866_v26  ;;  %v868_v29 = vpop.f32.mrb[31].mxu0  ;;  %v932_v32 = vpop.f32.mrb[31].mxu1  ;;  %v2631_v34 = vadd.f32 %v2491_v16, %v930_v27  ;;  %v1440_v49 = vmul.f32 %v2584_v11, %v2503_v30 }
 0x146   : > { %v1372_v38 = vpop.permute.xlu1 %1371 }
 0x147   : > { %v1469_v39 = vadd.f32 %v1468_v14, %v1438_v59  ;;  %v1507_v40 = vmul.f32 %v1438_v59, %v1438_v59  ;;  %v1967_v41 = vpack.c.bf16 %v1055_v28, %v1054_v22  ;;  %v1439_v16 = vmul.f32 %v2582_v36, %v1055_v28 }
 0x148   : > { %v2007_v44 = vpack.c.bf16 %v2631_v34, %v2628_v33 }
 0x149   : > { %v1538_v46 = vadd.f32 %v1537_v25, %v1507_v40  ;;  %2015 = vst [vmem:[%s2514_s16 + $0x38] sm:$0xff] %v1967_v41   ;;  %v1470_v48 = vadd.f32 %v1469_v39, %v1439_v16  ;;  %v1508_v50 = vmul.f32 %v1439_v16, %v1439_v16 }
 0x14a   : > { %2023 = vst [vmem:[%s2514_s16 + $0x78] sm:$0xff] %v2007_v44  }
 0x14b   : > { %2175 = shalt.err (!%p2172_p5)
}
 0x14c   : > { %s2176_s14 = scalar_lea.hbm %s2636_s30, 2048  ;;  %s2180_s16 = scalar_lea.hbm %s2725_s4, 16384 }
 0x14d   : > { %p2177_p6 = scmp.ne.s32.totalorder %s2636_s30, %s2176_s14  ;;  %p2181_p10 = scmp.lt.u32.totalorder %s2636_s30, %s2725_s4 }
 0x14e   : > { %p2182_p11 = scmp.lt.u32.totalorder %s2180_s16, %s2176_s14  ;;  %p2184_p13 = scmp.lt.u32.totalorder %s2176_s14, %s2636_s30 }
 0x14f   : > { %p2178_p7 = pnand %p2177_p6, %p2321_p4 }
 0x150   : > { %p2183_p12 = por %p2182_p11, %p2181_p10 }
 0x151   : > { %p2179_p9 = pneg %p2178_p7 }
 0x152   : > { %p2185_p0 = por %p2184_p13, %p2183_p12 }
 0x154   : > { %p2186_p1 = pnand %p2185_p0, %p2179_p9 }
 0x156   : > { %2189 = shalt.err (!%p2186_p1)
}
 0x157   : > { %s2244_s28 = smov 64   ;;  %s2245_s18 = smov 4   ;;  %v1509_v30 = vmul.f32 %v1440_v49, %v1440_v49  ;;  %v1442_v31 = vmul.f32 %v2600_v45, %v2521_v52  ;;  %v1471_v36 = vadd.f32 %v1470_v48, %v1440_v49  ;;  %v1539_v11 = vadd.f32 %v1538_v46, %v1508_v50  ;;  %v1382_v60 = vpop.permute.xlu1 %1381  ;;  %v1387_v35 = vpop.permute.xlu0 %1386 }
 0x158   : > { %2044 = dma.vmem_to_hbm [thread:$0]  (%p2321_p4), %s2638_s19, 2048, %s2636_s30, %s2650_s13, %s2244_s28, %s2244_s28, %s2245_s18   ;;  %v1510_v54 = vmul.f32 %v1441_v47, %v1441_v47  ;;  %v1443_v55 = vmul.f32 %v2616_v23, %v2524_v53  ;;  %v1444_v15 = vmul.f32 %v2618_v9, %v2538_v12  ;;  %v1445_v2 = vmul.f32 %v1372_v38, %v2541_v13 }
 0x159   : > { %v1472_v56 = vadd.f32 %v1471_v36, %v1441_v47  ;;  %v1540_v57 = vadd.f32 %v1539_v11, %v1509_v30  ;;  %v1511_v58 = vmul.f32 %v1442_v31, %v1442_v31  ;;  %v1446_v7 = vmul.f32 %v1377_v51, %v2556_v42  ;;  %p385_p4 = scmp.lt.s32.totalorder %s2232_s24, 7 }
 0x15a   : > { %v1512_v63 = vmul.f32 %v1443_v55, %v1443_v55  ;;  %v1513_v6 = vmul.f32 %v1444_v15, %v1444_v15  ;;  %v1514_v23 = vmul.f32 %v1445_v2, %v1445_v2  ;;  %v1447_v10 = vmul.f32 %v1382_v60, %v2559_v43 }
 0x15b   : > { %v1473_v61 = vadd.f32 %v1472_v56, %v1442_v31  ;;  %v1541_v62 = vadd.f32 %v1540_v57, %v1510_v54  ;;  %v1392_v3 = vpop.permute.xlu1 %1391  ;;  %v1397_v12 = vpop.permute.xlu0 %1396  ;;  %v1515_v9 = vmul.f32 %v1446_v7, %v1446_v7  ;;  %v1448_v20 = vmul.f32 %v1387_v35, %v2574_v4  ;;  %s2740_s24 = smov (!%p385_p4, %s2232_s24), 7 }
 0x15c   : > { %v1516_v24 = vmul.f32 %v1447_v10, %v1447_v10  ;;  %v1449_v18 = vmul.f32 %v1392_v3, %v2577_v5  ;;  %v1450_v27 = vmul.f32 %v1397_v12, %v2592_v17  ;;  %s1797_s7 = sshll.u32 %s2740_s24, 3 }
 0x15d   : > { %v1474_v52 = vadd.f32 %v1473_v61, %v1443_v55  ;;  %v1542_v45 = vadd.f32 %v1541_v62, %v1511_v58  ;;  %v1517_v42 = vmul.f32 %v1448_v20, %v1448_v20  ;;  %s391_s13 = scalar_lea.vmem %s2726_s5, %s1797_s7  ;;  %s398_s12 = scalar_lea.vmem %s2727_s6, %s1797_s7 }
 0x15e   : > { %v1518_v29 = vmul.f32 %v1449_v18, %v1449_v18  ;;  %v1519_v40 = vmul.f32 %v1450_v27, %v1450_v27 }
 0x15f   : > { %v1475_v8 = vadd.f32 %v1474_v52, %v1444_v15  ;;  %v1543_v53 = vadd.f32 %v1542_v45, %v1512_v63  ;;  %v1402_v13 = vpop.permute.xlu1 %1401  ;;  %v1407_v43 = vpop.permute.xlu0 %1406 }
 0x160   : > { %v1451_v32 = vmul.f32 %v1402_v13, %v2595_v37  ;;  %v1452_v41 = vmul.f32 %v1407_v43, %v2608_v0 }
 0x161   : > { %v1476_v14 = vadd.f32 %v1475_v8, %v1445_v2  ;;  %v1544_v19 = vadd.f32 %v1543_v53, %v1513_v6 }
 0x162   : > { %v1520_v5 = vmul.f32 %v1451_v32, %v1451_v32  ;;  %v1521_v48 = vmul.f32 %v1452_v41, %v1452_v41 }
 0x163   : > { %v1477_v21 = vadd.f32 %v1476_v14, %v1446_v7  ;;  %v1545_v22 = vadd.f32 %v1544_v19, %v1514_v23  ;;  %v1412_v4 = vpop.permute.xlu1 %1411  ;;  %v1417_v47 = vpop.permute.xlu0 %1416 }
 0x164   : > { %v1453_v44 = vmul.f32 %v1412_v4, %v2611_v1  ;;  %v1454_v50 = vmul.f32 %v1417_v47, %v2628_v33 }
 0x165   : > { %v1546_v25 = vadd.f32 %v1545_v22, %v1515_v9  ;;  %v1478_v26 = vadd.f32 %v1477_v21, %v1447_v10 }
 0x166   : > { %v1522_v31 = vmul.f32 %v1453_v44, %v1453_v44  ;;  %v1523_v60 = vmul.f32 %v1454_v50, %v1454_v50 }
 0x167   : > { %v1479_v59 = vadd.f32 %v1478_v26, %v1448_v20  ;;  %v1547_v28 = vadd.f32 %v1546_v25, %v1516_v24  ;;  %v1422_v30 = vpop.permute.xlu1 %1421 }
 0x168   : > { %v1455_v36 = vmul.f32 %v1422_v30, %v2631_v34 }
 0x169   : > { %v1480_v38 = vadd.f32 %v1479_v59, %v1449_v18  ;;  %v1548_v39 = vadd.f32 %v1547_v28, %v1517_v42 }
 0x16a   : > { %v1524_v56 = vmul.f32 %v1455_v36, %v1455_v36 }
 0x16b   : > { %v1481_v49 = vadd.f32 %v1480_v38, %v1450_v27  ;;  %v1549_v16 = vadd.f32 %v1548_v39, %v1518_v29 }
 0x16d   : > { %v1482_v46 = vadd.f32 %v1481_v49, %v1451_v32  ;;  %v1550_v17 = vadd.f32 %v1549_v16, %v1519_v40 }
 0x16f   : > { %v1483_v51 = vadd.f32 %v1482_v46, %v1452_v41  ;;  %v1551_v37 = vadd.f32 %v1550_v17, %v1520_v5 }
 0x171   : > { %v1484_v0 = vadd.f32 %v1483_v51, %v1453_v44  ;;  %v1552_v11 = vadd.f32 %v1551_v37, %v1521_v48 }
 0x173   : > { %v1485_v54 = vadd.f32 %v1484_v0, %v1454_v50  ;;  %v1553_v55 = vadd.f32 %v1552_v11, %v1522_v31 }
 0x175   : > { %v1486_v1 = vadd.f32 %v1485_v54, %v1455_v36  ;;  %v1554_v57 = vadd.f32 %v1553_v55, %v1523_v60 }
 0x177   : > { %v1487_v58 = vrot.slane %v1486_v1, 4  ;;  %v1555_v15 = vadd.f32 %v1554_v57, %v1524_v56 }
 0x179   : > { %v1488_v33 = vadd.f32 %v1487_v58, %v1486_v1  ;;  %v1556_v61 = vrot.slane %v1555_v15, 4 }
 0x17b   : > { %v1489_v62 = vrot.slane %v1488_v33, 2  ;;  %v1557_v35 = vadd.f32 %v1556_v61, %v1555_v15 }
 0x17d   : > { %v1490_v63 = vadd.f32 %v1489_v62, %v1488_v33  ;;  %v1558_v2 = vrot.slane %v1557_v35, 2 }
 0x17f   : > { %v1491_v34 = vrot.slane %v1490_v63, 1  ;;  %v1559_v52 = vadd.f32 %v1558_v2, %v1557_v35 }
 0x181   : > { %v1492_v45 = vadd.f32 %v1491_v34, %v1490_v63  ;;  %v1560_v3 = vrot.slane %v1559_v52, 1 }
 0x183   : > { %v1561_v6 = vadd.f32 %v1560_v3, %v1559_v52  ;;  %1562 = vst [vmem:[%s391_s13] sm:$0xff] %v1492_v45 }
 0x185   : > { %1563 = vst [vmem:[%s398_s12] sm:$0xff] %v1561_v6 }
 0x186 PF: > { %p2050_p2 = scmp.ge.s32.totalorder %s2240_s26, 2  ;;  %s1614_s24 = sand.u32 1, %s2220_s21  }
 0x187   : > { %s1615_s14 = scalar_lea.sflag [#allocation4], %s1614_s24 }
 0x188   : > { %p2047_p3 = pnand %p2050_p2, %p2328_p8 }
 0x18a   : > { %2215 = dma.done.wait (!%p2047_p3), %s1615_s14, 2048  }
 0x18b   : > { %2217 = vsyncadd (!%p2047_p3), %s1615_s14, 4294965248  ;;  %s20_s26 = sadd.s32 1, %s2240_s26   ;;  %s2730_s21 = smov %s2224_s22 }
 0x18c   : > { %p17_p5 = scmp.ge.s32.totalorder %s20_s26, 10   ;;  %s2731_s22 = smov %s2228_s23 }
 0x18d   : > { %s2732_s23 = smov %s2334_s10  ;;  %s2733_s24 = smov %s2236_s25 }
 0x18e   : > { %s2734_s25 = smov %s2736_s29  ;;  %19 = sbr.rel (!%p17_p5) target bundleno = 4 (0x4), region = 112 }
 0x195   :  { %1640 = vsyncpa [#allocation4], 1 }
 0x196   :  { %1642 = vsyncpa [#allocation4 + $0x1], 1 }

</bundles_post_ra>
